<compile_context>
chip_gen: v7x
topology: tpu7x:2x2x1
jax: 0.10.0
libtpu: 0.0.40
codegen_flags: <defaults>
</compile_context>

<pallas_src>
import functools

import jax
import jax.numpy as jnp
from jax.experimental import pallas as pl
from jax.experimental.pallas import tpu as pltpu


# ----------------------------------------------------------------------------
# Pallas kernel
# ----------------------------------------------------------------------------
def _attention_block5_kernel(
    g_ref, x_ref, y_ref, z_ref, w_ref,   # pixel tiles, (C_branch, TILE)
    p_ref,                               # packed params (F_int, C_total + 3)
    out_ref,                             # (F_l, TILE)
    cat_ref,                             # VMEM scratch (C_total, TILE)
    *, splits, precision,
):
    # Concatenate the five branch tiles along the sublane axis so the branch
    # projection is a single MXU matmul (one weight push, one result drain,
    # no per-branch accumulation on the VPU).
    off = 0
    for ref, c in zip((g_ref, x_ref, y_ref, z_ref, w_ref), splits):
        cat_ref[off:off + c, :] = ref[...]
        off += c
    c_total = off

    p = p_ref[...]                                              # (F_int, C_total + 3)
    w_branch = p[:, :c_total]                                   # (F_int, C_total)
    b_sum = p[:, c_total:c_total + 1].astype(jnp.float32)       # (F_int, 1)
    w_psi = p[:, c_total + 1:c_total + 2].astype(jnp.float32)   # (F_int, 1)
    b_psi = p[0:1, c_total + 2:c_total + 3].astype(jnp.float32)  # (1, 1)

    # NOTE: on a partial last pixel tile the out-of-range lanes of the inputs /
    # scratch hold uninitialized VMEM; they flow through relu/sigmoid (possibly
    # NaN) and are discarded by the masked output store.  Do not add any
    # reduction over the lane axis here without masking first.
    s = jnp.dot(w_branch, cat_ref[...],
                preferred_element_type=jnp.float32,
                precision=precision)                            # (F_int, TILE) f32
    s = jnp.maximum(s + b_sum, 0.0)                             # ReLU, f32

    # psi projection on VPU/XLU (a 1-wide MXU result would waste a drain):
    # (F_int, 1) * (F_int, TILE) -> sublane-reduce -> (1, TILE)
    psi = jnp.sum(s * w_psi, axis=0, keepdims=True) + b_psi
    psi = jax.nn.sigmoid(psi)                                   # (1, TILE) f32

    # Gate in the I/O dtype (bf16 on the fast path; psi in [0, 1]).
    out_ref[...] = x_ref[...] * psi.astype(out_ref.dtype)       # lane-dense store


def _round_up(a, b):
    return (a + b - 1) // b * b


def attention_block5(g, x, y, z, w, params, *, tile_pix=8192,
                     compute_dtype=jnp.bfloat16, precision=None):
    """NCHW wrapper matching the PyTorch forward: returns x * psi.

    compute_dtype is the in/out + MXU operand dtype (bf16 by default: halves
    HBM bytes and feeds the MXU natively).  Accumulation / ReLU / sigmoid are
    always f32.  Pass compute_dtype=jnp.float32 and
    precision=jax.lax.Precision.HIGHEST if bit-faithful f32 matmul is required
    (the MXU's DEFAULT precision may run f32 operands as bf16 passes).
    """
    N, F_l, H, W = x.shape
    HW = H * W
    splits = (g.shape[1], x.shape[1], y.shape[1], z.shape[1], w.shape[1])
    C_total = sum(splits)
    F_int = params["wg"].shape[0]

    # NCHW -> (N, C, H*W): reshape of contiguous dims (no data movement);
    # pixels land on the lane axis.
    def prep(a):
        n, c, h, wd = a.shape
        return a.reshape(n, c, h * wd).astype(compute_dtype)

    g3, x3, y3, z3, w3 = (prep(a) for a in (g, x, y, z, w))

    # Pack everything into ONE small parameter array (DMA'd once):
    # [W_g | W_x | W_y | W_z | W_w | b_sum | w_psi | b_psi].
    b_sum = (params["bg"] + params["bx"] + params["by"] + params["bz"]
             + params["bw"]).reshape(F_int, 1)
    w_psi = params["wp"].reshape(F_int, 1)
    b_psi = jnp.broadcast_to(params["bp"].reshape(1, 1), (F_int, 1))
    p_packed = jnp.concatenate(
        [params["wg"], params["wx"], params["wy"], params["wz"], params["ww"],
         b_sum, w_psi, b_psi], axis=1).astype(compute_dtype)   # (F_int, C_total+3)

    # Pixel tile: multiple of 128, clamped to the (rounded-up) spatial extent.
    tile = min(_round_up(tile_pix, 128), _round_up(HW, 128))
    # Keep >= 2 parallel grid steps when possible so v7x's two TensorCores are
    # both busy.
    if N == 1 and pl.cdiv(HW, tile) < 2 and _round_up(HW, 128) >= 256:
        tile = _round_up(pl.cdiv(HW, 2), 128)
    grid = (N, pl.cdiv(HW, tile))    # partial last tile handled by Pallas

    def pix_spec(c):
        return pl.BlockSpec((None, c, tile), lambda n, i: (n, 0, i))

    kernel = functools.partial(_attention_block5_kernel,
                               splits=splits, precision=precision)

    out3 = pl.pallas_call(
        kernel,
        out_shape=jax.ShapeDtypeStruct((N, F_l, HW), compute_dtype),
        grid_spec=pltpu.PrefetchScalarGridSpec(
            num_scalar_prefetch=0,
            grid=grid,
            in_specs=[
                pix_spec(splits[0]), pix_spec(splits[1]), pix_spec(splits[2]),
                pix_spec(splits[3]), pix_spec(splits[4]),
                pl.BlockSpec(p_packed.shape, lambda n, i: (0, 0)),
            ],
            out_specs=pl.BlockSpec((None, F_l, tile), lambda n, i: (n, 0, i)),
            scratch_shapes=[pltpu.VMEM((C_total, tile), compute_dtype)],
        ),
        compiler_params=pltpu.CompilerParams(
            dimension_semantics=("parallel", "parallel")),
    )(g3, x3, y3, z3, w3, p_packed)

    return out3.reshape(N, F_l, H, W)


# ----------------------------------------------------------------------------
# Parameter construction (deterministic) and exact eval-mode BN folding (glue).
# ----------------------------------------------------------------------------
def _fold_conv_bn(key, c_in, c_out, eps=1e-5):
    """Deterministic 1x1 conv + eval-mode BN, folded into an equivalent
    (c_out, c_in) weight and (c_out,) bias."""
    k1, k2, k3, k4, k5, k6 = jax.random.split(key, 6)
    conv_w = jax.random.normal(k1, (c_out, c_in), jnp.float32) * 0.2
    conv_b = jax.random.normal(k2, (c_out,), jnp.float32) * 0.1
    gamma = 1.0 + 0.1 * jax.random.normal(k3, (c_out,), jnp.float32)
    beta = 0.1 * jax.random.normal(k4, (c_out,), jnp.float32)
    run_mean = 0.1 * jax.random.normal(k5, (c_out,), jnp.float32)
    run_var = jnp.abs(jax.random.normal(k6, (c_out,), jnp.float32)) + 0.5
    scale = gamma / jnp.sqrt(run_var + eps)
    w_eff = conv_w * scale[:, None]                     # (c_out, c_in)
    b_eff = (conv_b - run_mean) * scale + beta          # (c_out,)
    return w_eff, b_eff


def make_params(key, F_g, F_l, F_m, F_n, F_o, F_int):
    ks = jax.random.split(key, 6)
    wg, bg = _fold_conv_bn(ks[0], F_g, F_int)
    wx, bx = _fold_conv_bn(ks[1], F_l, F_int)
    wy, by = _fold_conv_bn(ks[2], F_m, F_int)
    wz, bz = _fold_conv_bn(ks[3], F_n, F_int)
    ww, bw = _fold_conv_bn(ks[4], F_o, F_int)
    wp, bp = _fold_conv_bn(ks[5], F_int, 1)             # wp: (1, F_int), bp: (1,)
    return dict(wg=wg, bg=bg, wx=wx, bx=bx, wy=wy, by=by,
                wz=wz, bz=bz, ww=ww, bw=bw,
                wp=wp.T,                                # (F_int, 1)
                bp=bp.reshape(1, 1))                    # (1, 1)


def _reference(g, x, y, z, w, p):
    """Pure-JAX f32 reference (eval-mode BN folded), NCHW in/out."""
    def lin(a, wt, b):                                  # wt: (F_int, C), b: (F_int,)
        return jnp.einsum("fc,nchw->nfhw", wt, a) + b[None, :, None, None]
    s = (lin(g, p["wg"], p["bg"]) + lin(x, p["wx"], p["bx"]) +
         lin(y, p["wy"], p["by"]) + lin(z, p["wz"], p["bz"]) +
         lin(w, p["ww"], p["bw"]))
    s = jnp.maximum(s, 0.0)
    psi = jax.nn.sigmoid(jnp.einsum("fo,nfhw->nohw", p["wp"], s) + p["bp"][0, 0])
    return x * psi


if __name__ == "__main__":
    # Small, forward-consistent shapes.
    N, H, W = 2, 16, 16
    F_g, F_l, F_m, F_n, F_o, F_int = 4, 4, 6, 3, 5, 8

    key = jax.random.PRNGKey(0)
    kg, kx, ky, kz, kw, kp = jax.random.split(key, 6)
    g = jax.random.normal(kg, (N, F_g, H, W), jnp.float32)
    x = jax.random.normal(kx, (N, F_l, H, W), jnp.float32)
    y = jax.random.normal(ky, (N, F_m, H, W), jnp.float32)
    z = jax.random.normal(kz, (N, F_n, H, W), jnp.float32)
    w = jax.random.normal(kw, (N, F_o, H, W), jnp.float32)
    params = make_params(kp, F_g, F_l, F_m, F_n, F_o, F_int)

    ref = _reference(g, x, y, z, w, params)

    # f32 I/O path.  Tolerance covers the MXU's DEFAULT precision (which may run
    # f32 operands as bf16 passes); pass precision=jax.lax.Precision.HIGHEST for
    # bit-faithful f32.
    out_f32 = jax.block_until_ready(
        attention_block5(g, x, y, z, w, params, compute_dtype=jnp.float32))
    assert out_f32.shape == (N, F_l, H, W)
    assert jnp.allclose(out_f32, ref, atol=1e-2, rtol=1e-2)

    # Fast path: bf16 I/O + bf16xbf16 MXU, f32 accumulation/elementwise math.
    out_bf16 = jax.block_until_ready(
        attention_block5(g, x, y, z, w, params, compute_dtype=jnp.bfloat16))
    assert out_bf16.shape == (N, F_l, H, W)
    assert out_bf16.dtype == jnp.bfloat16
    assert jnp.allclose(out_bf16.astype(jnp.float32), ref, atol=5e-2, rtol=5e-2)

    print("KERNEL_OK")
</pallas_src>

<mosaic_0001>
module attributes {stable_mosaic.version = 11 : i64} {
  func.func @_attention_block5_kernel(%arg0: i32, %arg1: i32, %arg2: memref<1x4x256xf32, #tpu.memory_space<vmem>>, %arg3: memref<1x4x256xf32, #tpu.memory_space<vmem>>, %arg4: memref<1x6x256xf32, #tpu.memory_space<vmem>>, %arg5: memref<1x3x256xf32, #tpu.memory_space<vmem>>, %arg6: memref<1x5x256xf32, #tpu.memory_space<vmem>>, %arg7: memref<8x25xf32, #tpu.memory_space<vmem>>, %arg8: memref<1x4x256xf32, #tpu.memory_space<vmem>>, %arg9: memref<22x256xf32, #tpu.memory_space<vmem>>) attributes {dimension_semantics = [#tpu.dimension_semantics<parallel>, #tpu.dimension_semantics<parallel>], iteration_bounds = array<i64: 2, 1>, scalar_prefetch = 0 : i64, scratch_operands = 1 : i64, tpu.core_type = #tpu.core_type<tc>, window_params = [{transform_indices = @transform_0, window_bounds = array<i64: 1, 4, 256>}, {transform_indices = @transform_1, window_bounds = array<i64: 1, 4, 256>}, {transform_indices = @transform_2, window_bounds = array<i64: 1, 6, 256>}, {transform_indices = @transform_3, window_bounds = array<i64: 1, 3, 256>}, {transform_indices = @transform_4, window_bounds = array<i64: 1, 5, 256>}, {pipeline_mode = #tpu.pipeline_mode<synchronous>, transform_indices = @transform_5, window_bounds = array<i64: 8, 25>}, {transform_indices = @transform_6, window_bounds = array<i64: 1, 4, 256>}]} {
    %c0 = arith.constant 0 : index
    %c0_0 = arith.constant 0 : index
    %c0_1 = arith.constant 0 : index
    %0 = vector.load %arg2[%c0, %c0_0, %c0_1] : memref<1x4x256xf32, #tpu.memory_space<vmem>>, vector<1x4x256xf32>
    %1 = vector.shape_cast %0 : vector<1x4x256xf32> to vector<4x256xf32>
    %c0_2 = arith.constant 0 : index
    %c0_3 = arith.constant 0 : index
    %2 = vector.load %arg9[%c0_2, %c0_3] : memref<22x256xf32, #tpu.memory_space<vmem>>, vector<4x256xf32>
    tpu.vector_store %arg9[%c0_2, %c0_3], %1 {strides = array<i32>} : memref<22x256xf32, #tpu.memory_space<vmem>>, vector<4x256xf32>,
    %c0_4 = arith.constant 0 : index
    %c0_5 = arith.constant 0 : index
    %c0_6 = arith.constant 0 : index
    %3 = vector.load %arg3[%c0_4, %c0_5, %c0_6] : memref<1x4x256xf32, #tpu.memory_space<vmem>>, vector<1x4x256xf32>
    %4 = vector.shape_cast %3 : vector<1x4x256xf32> to vector<4x256xf32>
    %c4 = arith.constant 4 : index
    %c0_7 = arith.constant 0 : index
    %5 = vector.load %arg9[%c4, %c0_7] : memref<22x256xf32, #tpu.memory_space<vmem>>, vector<4x256xf32>
    tpu.vector_store %arg9[%c4, %c0_7], %4 {strides = array<i32>} : memref<22x256xf32, #tpu.memory_space<vmem>>, vector<4x256xf32>,
    %c0_8 = arith.constant 0 : index
    %c0_9 = arith.constant 0 : index
    %c0_10 = arith.constant 0 : index
    %6 = vector.load %arg4[%c0_8, %c0_9, %c0_10] : memref<1x6x256xf32, #tpu.memory_space<vmem>>, vector<1x6x256xf32>
    %7 = vector.shape_cast %6 : vector<1x6x256xf32> to vector<6x256xf32>
    %c8 = arith.constant 8 : index
    %c0_11 = arith.constant 0 : index
    %8 = vector.load %arg9[%c8, %c0_11] : memref<22x256xf32, #tpu.memory_space<vmem>>, vector<6x256xf32>
    tpu.vector_store %arg9[%c8, %c0_11], %7 {strides = array<i32>} : memref<22x256xf32, #tpu.memory_space<vmem>>, vector<6x256xf32>,
    %c0_12 = arith.constant 0 : index
    %c0_13 = arith.constant 0 : index
    %c0_14 = arith.constant 0 : index
    %9 = vector.load %arg5[%c0_12, %c0_13, %c0_14] : memref<1x3x256xf32, #tpu.memory_space<vmem>>, vector<1x3x256xf32>
    %10 = vector.shape_cast %9 : vector<1x3x256xf32> to vector<3x256xf32>
    %c14 = arith.constant 14 : index
    %c0_15 = arith.constant 0 : index
    %11 = vector.load %arg9[%c14, %c0_15] : memref<22x256xf32, #tpu.memory_space<vmem>>, vector<3x256xf32>
    tpu.vector_store %arg9[%c14, %c0_15], %10 {strides = array<i32>} : memref<22x256xf32, #tpu.memory_space<vmem>>, vector<3x256xf32>,
    %c0_16 = arith.constant 0 : index
    %c0_17 = arith.constant 0 : index
    %c0_18 = arith.constant 0 : index
    %12 = vector.load %arg6[%c0_16, %c0_17, %c0_18] : memref<1x5x256xf32, #tpu.memory_space<vmem>>, vector<1x5x256xf32>
    %13 = vector.shape_cast %12 : vector<1x5x256xf32> to vector<5x256xf32>
    %c17 = arith.constant 17 : index
    %c0_19 = arith.constant 0 : index
    %14 = vector.load %arg9[%c17, %c0_19] : memref<22x256xf32, #tpu.memory_space<vmem>>, vector<5x256xf32>
    tpu.vector_store %arg9[%c17, %c0_19], %13 {strides = array<i32>} : memref<22x256xf32, #tpu.memory_space<vmem>>, vector<5x256xf32>,
    %c0_20 = arith.constant 0 : index
    %c0_21 = arith.constant 0 : index
    %15 = vector.load %arg7[%c0_20, %c0_21] : memref<8x25xf32, #tpu.memory_space<vmem>>, vector<8x25xf32>
    %16 = vector.extract_strided_slice %15 {offsets = [0, 0], sizes = [8, 22], strides = [1, 1]} : vector<8x25xf32> to vector<8x22xf32>
    %17 = vector.extract_strided_slice %15 {offsets = [0, 22], sizes = [8, 1], strides = [1, 1]} : vector<8x25xf32> to vector<8x1xf32>
    %18 = vector.extract_strided_slice %15 {offsets = [0, 23], sizes = [8, 1], strides = [1, 1]} : vector<8x25xf32> to vector<8x1xf32>
    %19 = vector.extract_strided_slice %15 {offsets = [0, 24], sizes = [1, 1], strides = [1, 1]} : vector<8x25xf32> to vector<1x1xf32>
    %c0_22 = arith.constant 0 : index
    %c0_23 = arith.constant 0 : index
    %20 = vector.load %arg9[%c0_22, %c0_23] : memref<22x256xf32, #tpu.memory_space<vmem>>, vector<22x256xf32>
    %cst = arith.constant dense<0.000000e+00> : vector<8x256xf32>
    %21 = tpu.matmul %16, %20, %cst {dimension_numbers = #tpu.dot_dimension_numbers<[1], [0], [0], [1], [0, 0, 1, 1], [], []>} : vector<8x22xf32>, vector<22x256xf32>, vector<8x256xf32> -> vector<8x256xf32>
    %22 = vector.broadcast %17 : vector<8x1xf32> to vector<8x256xf32>
    %23 = arith.addf %21, %22 : vector<8x256xf32>
    %cst_24 = arith.constant 0.000000e+00 : f32
    %24 = vector.broadcast %cst_24 : f32 to vector<8x256xf32>
    %25 = arith.maximumf %23, %24 : vector<8x256xf32>
    %26 = vector.broadcast %18 : vector<8x1xf32> to vector<8x256xf32>
    %27 = arith.mulf %25, %26 : vector<8x256xf32>
    %cst_25 = arith.constant dense<0.000000e+00> : vector<256xf32>
    %28 = vector.multi_reduction <add>, %27, %cst_25 [0] : vector<8x256xf32> to vector<256xf32>
    %29 = vector.shape_cast %28 : vector<256xf32> to vector<1x256xf32>
    %30 = vector.broadcast %19 : vector<1x1xf32> to vector<1x256xf32>
    %31 = arith.addf %29, %30 : vector<1x256xf32>
    %32 = arith.negf %31 : vector<1x256xf32>
    %33 = math.exp %32 : vector<1x256xf32>
    %cst_26 = arith.constant 1.000000e+00 : f32
    %34 = vector.broadcast %cst_26 : f32 to vector<1x256xf32>
    %35 = arith.addf %34, %33 : vector<1x256xf32>
    %36 = arith.divf %34, %35 : vector<1x256xf32>
    %c0_27 = arith.constant 0 : index
    %c0_28 = arith.constant 0 : index
    %c0_29 = arith.constant 0 : index
    %37 = vector.load %arg3[%c0_27, %c0_28, %c0_29] : memref<1x4x256xf32, #tpu.memory_space<vmem>>, vector<1x4x256xf32>
    %38 = vector.shape_cast %37 : vector<1x4x256xf32> to vector<4x256xf32>
    %39 = vector.broadcast %36 : vector<1x256xf32> to vector<4x256xf32>
    %40 = arith.mulf %38, %39 : vector<4x256xf32>
    %c0_30 = arith.constant 0 : index
    %c0_31 = arith.constant 0 : index
    %c0_32 = arith.constant 0 : index
    %41 = vector.load %arg8[%c0_30, %c0_31, %c0_32] : memref<1x4x256xf32, #tpu.memory_space<vmem>>, vector<1x4x256xf32>
    %42 = vector.shape_cast %41 : vector<1x4x256xf32> to vector<4x256xf32>
    %43 = vector.shape_cast %40 : vector<4x256xf32> to vector<1x4x256xf32>
    tpu.vector_store %arg8[%c0_30, %c0_31, %c0_32], %43 {strides = array<i32>} : memref<1x4x256xf32, #tpu.memory_space<vmem>>, vector<1x4x256xf32>,
    return
  }
  func.func @transform_0(%arg0: i32, %arg1: i32) -> (i32, i32, i32) {
    %c0_i32 = arith.constant 0 : i32
    %c0_i32_0 = arith.constant 0 : i32
    return %arg0, %c0_i32, %arg1 : i32, i32, i32
  }
  func.func @transform_1(%arg0: i32, %arg1: i32) -> (i32, i32, i32) {
    %c0_i32 = arith.constant 0 : i32
    %c0_i32_0 = arith.constant 0 : i32
    return %arg0, %c0_i32, %arg1 : i32, i32, i32
  }
  func.func @transform_2(%arg0: i32, %arg1: i32) -> (i32, i32, i32) {
    %c0_i32 = arith.constant 0 : i32
    %c0_i32_0 = arith.constant 0 : i32
    return %arg0, %c0_i32, %arg1 : i32, i32, i32
  }
  func.func @transform_3(%arg0: i32, %arg1: i32) -> (i32, i32, i32) {
    %c0_i32 = arith.constant 0 : i32
    %c0_i32_0 = arith.constant 0 : i32
    return %arg0, %c0_i32, %arg1 : i32, i32, i32
  }
  func.func @transform_4(%arg0: i32, %arg1: i32) -> (i32, i32, i32) {
    %c0_i32 = arith.constant 0 : i32
    %c0_i32_0 = arith.constant 0 : i32
    return %arg0, %c0_i32, %arg1 : i32, i32, i32
  }
  func.func @transform_5(%arg0: i32, %arg1: i32) -> (i32, i32) {
    %c0_i32 = arith.constant 0 : i32
    %c0_i32_0 = arith.constant 0 : i32
    %c0_i32_1 = arith.constant 0 : i32
    return %c0_i32, %c0_i32_0 : i32, i32
  }
  func.func @transform_6(%arg0: i32, %arg1: i32) -> (i32, i32, i32) {
    %c0_i32 = arith.constant 0 : i32
    %c0_i32_0 = arith.constant 0 : i32
    return %arg0, %c0_i32, %arg1 : i32, i32, i32
  }
}

</mosaic_0001>

<bundles_post_ra>
// kernel: tpu_custom_call.1
= control target key start
LH: loop header
LB: loop body
LE: loop exit
PB: predicated region body
PF: predicated region fallthrough
CT: control target
= control target key end

     0   :  { %s1136_s0 = inlined_call_operand.vmem [shape: f32[2,4,256], index: 0, kind: input, shape index: {}]   ;;  %s1137_s1 = inlined_call_operand.vmem [shape: f32[2,4,256], index: 1, kind: input, shape index: {}]   ;;  %s1138_s2 = inlined_call_operand.vmem [shape: f32[2,6,256], index: 2, kind: input, shape index: {}]   ;;  %s1139_s3 = inlined_call_operand.vmem [shape: f32[2,3,256], index: 3, kind: input, shape index: {}]   ;;  %s1140_s4 = inlined_call_operand.vmem [shape: f32[2,5,256], index: 4, kind: input, shape index: {}]   ;;  %s1141_s5 = inlined_call_operand.vmem [shape: f32[8,25], index: 5, kind: input, shape index: {}]   ;;  %s1142_s6 = inlined_call_operand.hbm [shape: f32[2,4,256], index: 6, kind: output, shape index: {}]  }
   0x1   :  { %1143 = sst [smem:[#allocation6_spill]] %s1141_s5 }
   0x2   :  { %11 = vsyncpa [#allocation4], 0 }
   0x3   :  { %13 = vsyncpa [#allocation4 + $0x1], 0  ;;  %s1003_s21 = smov 0   ;;  %s1005_s22 = smov 0  }
   0x4   :  { %s1007_s23 = smov 0   ;;  %s1009_s24 = smov 0  }
   0x5   :  { %s1011_s25 = smov 0   ;;  %s1013_s26 = smov 0  }
   0x6 LB: > { %s773_s27 = sadd.s32 4294967295, %s961_s26   ;;  %s774_s28 = sadd.s32 4294967294, %s961_s26   ;;  %s961_s26 = sphi %s1013_s26, %s19_s26   ;;  %s957_s25 = sphi %s1011_s25, %s1151_s25   ;;  %s953_s24 = sphi %s1009_s24, %s1150_s24   ;;  %s949_s23 = sphi %s1007_s23, %s1149_s23   ;;  %s945_s22 = sphi %s1005_s22, %s1148_s22   ;;  %s941_s21 = sphi %s1003_s21, %s1147_s21  }
   0x7   : > { %s31_s29 = sadd.s32 1, %s957_s25  ;;  %s201_s30 = sadd.s32 1, %s949_s23 }
   0x8   : > { %p33_p0 = scmp.ge.s32.totalorder %s31_s29, 2  ;;  %p211_p1 = scmp.ne.s32.totalorder %s949_s23, %s945_s22 }
   0x9   : > { %p212_p2 = scmp.eq.s32.totalorder %s773_s27, 1  ;;  %p217_p3 = scmp.ne.s32.totalorder %s945_s22, %s941_s21 }
   0xa   : > { %s1153_s29 = smov (%p33_p0, %s31_s29), 0  ;;  %p218_p5 = scmp.eq.s32.totalorder %s774_s28, 1 }
   0xb   : > { %p1043_p4 = por %p212_p2, %p211_p1  ;;  %s196_s8 = ssub.s32 %s957_s25, %s1153_s29 }
   0xc   : > { %p777_p6 = scmp.ge.s32.totalorder %s961_s26, 1  ;;  %p199_p7 = scmp.eq.s32.totalorder %s196_s8, 0 }
   0xd   : > { %p1050_p8 = por %p218_p5, %p217_p3  ;;  %p304_p9 = scmp.lt.s32.totalorder %s961_s26, 3 }
   0xe   : > { %s1056_s10 = scalar_select %p199_p7, %s949_s23, %s201_s30  }
   0xf   : > { %p305_p10 = pnand %p777_p6, %p304_p9 }
  0x10   : > { %p375_p11 = scmp.lt.s32.totalorder (!%p305_p10), %s953_s24, 1  ;;  %v963_v0 = vmov (!%p305_p10), 0.0   ;;  %s1146_s5 = sld [smem:[#allocation6_spill]] (!%p305_p10)  ;;  %v964_v2 = vmov (!%p305_p10), 22   ;;  %v965_v3 = vmov (!%p305_p10), 24   ;;  %v966_v6 = vmov (!%p305_p10), 23  }
  0x11   : > { %308 = sbr.rel (%p305_p10) target bundleno = 331 (0x14b), region = 44  ;;  %548 = vmatprep.mubr.f32.mxu0 (!%p305_p10), %v963_v0  ;;  %868 = vset.pattern.permute.xlu0 (!%p305_p10), %v964_v2  ;;  %vm477_vm0 = vcmask (!%p305_p10), 1045504   ;;  %vm474_vm1 = vcmask (!%p305_p10), 179200   ;;  %v594_v58 = vlaneseq (!%p305_p10) }
  0x12   : > { %870 = vset.pattern.permute.xlu1 (!%p305_p10), %v965_v3 }
  0x13   : > { %v595_v59 = vshrl.u32 (!%p305_p10), %v594_v58, 7 }
  0x15   : > { %v596_v60 = vsub.s32 (!%p305_p10), 0, %v595_v59 }
  0x16   : > { %v462_v1 = vld [vmem:[%s1146_s5] sm:$0xff] (!%p305_p10) }
  0x17   : > { %471 = vperm.xlu0 (!%p305_p10), %868, %v462_v1   ;;  %576 = vperm.xlu1 (!%p305_p10), %870, %v462_v1  }
  0x18   : > { %s376_s13 = scalar_select %p375_p11, %s953_s24, 1 }
  0x1a   : > { %s799_s14 = sshll.u32 %s376_s13, 3  ;;  %s801_s15 = sshll.u32 %s376_s13, 4 }
  0x1b   : > { %s382_s18 = scalar_lea.vmem %s1136_s0, %s799_s14  ;;  %s392_s27 = scalar_lea.vmem %s1137_s1, %s799_s14  ;;  %869 = vset.pattern.permute.xlu0 %v966_v6 }
  0x1c   : > { %s402_s8 = scalar_lea.vmem %s1138_s2, %s801_s15  ;;  %s412_s5 = scalar_lea.vmem %s1139_s3, %s799_s14  ;;  %v425_v4 = vld [vmem:[%s382_s18] sm:$0xff]  ;;  %558 = vperm.xlu0 %869, %v462_v1  }
  0x1d   : > { %v1075_v5 = vld [vmem:[%s392_s27] sm:$0xff]  ;;  %s422_s17 = scalar_lea.vmem %s1140_s4, %s801_s15  ;;  %v427_v7 = vcombine.high %v425_v4, %v425_v4  ;;  %v438_v8 = vld [vmem:[%s402_s8 + $0x8] sm:$0x3f]  ;;  %429 = vst [vmem:[#allocation2] sm:$0xf] %v425_v4  ;;  %s804_s15 = sshll.u32 %s953_s24, 7 }
  0x1e   : > { %436 = vst [vmem:[#allocation2 + $0x8] sm:$0xf0] %v1075_v5  ;;  %v441_v9 = vld [vmem:[%s412_s5] sm:$0x77]  ;;  %v433_v10 = vcombine.low %v1075_v5, %v1075_v5  ;;  %440 = vst [vmem:[#allocation2 + $0x18] sm:$0x3f] %v438_v8  ;;  %s1089_s28 = scalar_lea.hbm %s1142_s6, %s804_s15 }
  0x1f   : > { %v437_v11 = vld [vmem:[%s402_s8] sm:$0x3f]  ;;  %v443_v12 = vcombine.high %v441_v9, %v441_v9  ;;  %v444_v13 = vrot.slane %v441_v9, 2  ;;  %v453_v14 = vld [vmem:[%s422_s17 + $0x8] sm:$0x1f]  ;;  %s371_s5 = sand.u32 1, %s945_s22  }
  0x20   : > { %439 = vst [vmem:[#allocation2 + $0x10] sm:$0x3f] %v437_v11  ;;  %v452_v15 = vld [vmem:[%s422_s17] sm:$0x1f]  ;;  %430 = vst [vmem:[#allocation2 + $0x8] sm:$0xf] %v427_v7  ;;  %871 = vset.pattern.permute.xlu0 %v965_v3 }
  0x21   : > { %435 = vst [vmem:[#allocation2] sm:$0xf0] %v433_v10  ;;  %v457_v16 = vrot.slane %v453_v14, 7  ;;  %v456_v17 = vrot.slane %v452_v15, 7  ;;  %v445_v18 = vrot.slane %v443_v12, 2  ;;  %s778_s14 = sshll.u32 %s371_s5, 3 }
  0x22   : > { %448 = vst [vmem:[#allocation2 + $0x20] ss:$-12 sps:$4 sm:$0xc1] %v444_v13   ;;  %s373_s18 = scalar_lea.vmem [#allocation3], %s778_s14  ;;  %s609_s30 = scalar_lea.sflag [#allocation4], %s371_s5 }
  0x23   : > { %461 = vst [vmem:[#allocation2 + $0x28] sm:$0x3e] %v457_v16  ;;  %460 = vst [vmem:[#allocation2 + $0x20] sm:$0x3e] %v456_v17  ;;  %s625_s19 = sshll.u32 %s373_s18, 4  ;;  %s967_s24 = smov [#allocation3]   ;;  %s1091_s19 = int_to_ptr.vmem [resolvable:$true] %s625_s19 }
  0x24   : > { %449 = vst [vmem:[#allocation2 + $0x28] ss:$-12 sps:$4 sm:$0xc1] %v445_v18   ;;  %s883_s8 = scalar_lea.vmem %s1091_s19, 128  ;;  %s887_s11 = sshll.u32 %s967_s24, 4  ;;  %s888_s11 = int_to_ptr.vmem [resolvable:$false] %s887_s11 }
  0x25   : > { %p884_p12 = scmp.ne.s32.totalorder %s1091_s19, %s883_s8  ;;  %s889_s12 = scalar_lea.vmem %s888_s11, 256 }
  0x26   : > { %p890_p1 = scmp.lt.s32.totalorder %s1091_s19, %s888_s11  ;;  %p891_p2 = scmp.lt.s32.totalorder %s889_s12, %s883_s8 }
  0x27   : > { %v464_v20 = vld [vmem:[#allocation2 + $0x8] sm:$0xff]  ;;  %p885_p13 = pnand %p884_p12, %p1043_p4 }
  0x28   : > { %v463_v19 = vld [vmem:[#allocation2] sm:$0xff]  ;;  %p892_p3 = por %p891_p2, %p890_p1 }
  0x29   : > { %v465_v21 = vld [vmem:[#allocation2 + $0x10] sm:$0xff]  ;;  %p886_p0 = pneg %p885_p13 }
  0x2a   : > { %v807_v23 = vpack.c.bf16 %v465_v21, %v463_v19  ;;  %v467_v26 = vld [vmem:[#allocation2 + $0x20] sm:$0x3f] }
  0x2b   : > { %v466_v22 = vld [vmem:[#allocation2 + $0x18] sm:$0xff]  ;;  %v468_v25 = vld [vmem:[#allocation2 + $0x28] sm:$0x3f]  ;;  %p893_p5 = pnand %p892_p3, %p886_p0 }
  0x2c   : > { %v805_v24 = vpack.c.bf16 %v466_v22, %v464_v20 }
  0x2e   : > { %806 = vmatprep.subr.bf16.mxu0 %v805_v24 }
  0x2f   : > { %808 = vmatpush1.bf16.msra.mxu0 %v807_v23 }
  0x30   : > { %789 = vmatprep.subr.msk.mxu0 %vm477_vm0, %v468_v25 }
  0x33   : > { %790 = vmatpush1.msk.msra.mxu0 %vm477_vm0, %v467_v26 }
  0x34   : > { %791 = vmatmul.mubr.msk.f32.vlgmr.msra.gmra.mrb[0].mxu0 %vm474_vm1, %v462_v1 }
  0x96   : > { %v472_v27 = vpop.permute.xlu0 %471  ;;  %v577_v46 = vpop.permute.xlu1 %576 }
  0x9b   : > { %v559_v32 = vpop.permute.xlu0 %558 }
 0x107   : > { %v550_v28 = vpop.f32.mrb[0].mxu0 }
 0x108   : > { %v551_v29 = vadd.f32 %v550_v28, %v472_v27  ;;  %v552_v30 = vpop.f32.mrb[1].mxu0 }
 0x109   : > { %v553_v31 = vadd.f32 %v552_v30, %v472_v27 }
 0x10a   : > { %v555_v33 = vmax.f32 %v551_v29, 0.0 }
 0x10b   : > { %v556_v34 = vmax.f32 %v553_v31, 0.0 }
 0x10c   : > { %v561_v35 = vmul.f32 %v559_v32, %v555_v33 }
 0x10d   : > { %v562_v36 = vmul.f32 %v559_v32, %v556_v34 }
 0x10e   : > { %v563_v37 = vrot.slane %v561_v35, 4 }
 0x10f   : > { %v569_v38 = vrot.slane %v562_v36, 4 }
 0x110   : > { %v564_v39 = vadd.f32 %v563_v37, %v561_v35 }
 0x111   : > { %v570_v40 = vadd.f32 %v569_v38, %v562_v36 }
 0x112   : > { %v565_v41 = vrot.slane %v564_v39, 2 }
 0x113   : > { %v571_v42 = vrot.slane %v570_v40, 2 }
 0x114   : > { %v566_v43 = vadd.f32 %v565_v41, %v564_v39 }
 0x115   : > { %v572_v44 = vadd.f32 %v571_v42, %v570_v40 }
 0x116   : > { %v567_v45 = vrot.slane %v566_v43, 1 }
 0x117   : > { %v573_v47 = vrot.slane %v572_v44, 1 }
 0x118   : > { %v568_v48 = vadd.f32 %v567_v45, %v566_v43 }
 0x119   : > { %v574_v49 = vadd.f32 %v573_v47, %v572_v44 }
 0x11a   : > { %v579_v50 = vadd.f32 %v577_v46, %v568_v48 }
 0x11b   : > { %v580_v51 = vadd.f32 %v577_v46, %v574_v49 }
 0x11c   : > { %v792_v52 = vmul.f32 -1.442695, %v579_v50 }
 0x11d   : > { %v793_v53 = vmul.f32 -1.442695, %v580_v51 }
 0x11e   : > { %875 = vpow2.f32 %v792_v52 }
 0x11f   : > { %877 = vpow2.f32 %v793_v53 }
 0x128   : > { %v876_v54 = vpop.eup %875 }
 0x129   : > { %v878_v55 = vpop.eup %877  ;;  %v587_v56 = vadd.f32 1.0, %v876_v54 }
 0x12a   : > { %v588_v57 = vadd.f32 1.0, %v878_v55 }
 0x12b   : > { %879 = vrcp.f32 %v587_v56 }
 0x12c   : > { %881 = vrcp.f32 %v588_v57 }
 0x135   : > { %v880_v61 = vpop.eup %879 }
 0x136   : > { %v882_v62 = vpop.eup %881  ;;  %v597_v63 = vrot.slane %v880_v61, %v596_v60 }
 0x137   : > { %v601_v0 = vrot.slane %v882_v62, %v596_v60 }
 0x139   : > { %v604_v1 = vcombine.low %v597_v63, %v601_v0 }
 0x13b   : > { %v606_v2 = vmul.f32 %v604_v1, %v1075_v5 }
 0x13d   : > { %607 = vst [vmem:[%s373_s18] sm:$0xff] %v606_v2 }
 0x13e   : > { %896 = shalt.err (!%p893_p5)
}
 0x13f   : > { %s897_s13 = scalar_lea.hbm %s1089_s28, 128  ;;  %s901_s5 = scalar_lea.hbm %s1142_s6, 256 }
 0x140   : > { %p898_p6 = scmp.ne.s32.totalorder %s1089_s28, %s897_s13  ;;  %p902_p10 = scmp.lt.u32.totalorder %s1089_s28, %s1142_s6 }
 0x141   : > { %p903_p11 = scmp.lt.u32.totalorder %s901_s5, %s897_s13  ;;  %p905_p13 = scmp.lt.u32.totalorder %s897_s13, %s1089_s28 }
 0x142   : > { %p899_p7 = pnand %p898_p6, %p1043_p4 }
 0x143   : > { %p904_p12 = por %p903_p11, %p902_p10 }
 0x144   : > { %p900_p9 = pneg %p899_p7 }
 0x145   : > { %p906_p0 = por %p905_p13, %p904_p12 }
 0x147   : > { %p907_p1 = pnand %p906_p0, %p900_p9 }
 0x149   : > { %910 = shalt.err (!%p907_p1)
}
 0x14a   : > { %809 = dma.vmem_to_hbm [thread:$0]  (%p1043_p4), %s1091_s19, 128, %s1089_s28, %s609_s30  }
 0x14b PF: > { %p815_p2 = scmp.ge.s32.totalorder %s961_s26, 2  ;;  %s637_s18 = sand.u32 1, %s941_s21  }
 0x14c   : > { %s638_s20 = scalar_lea.sflag [#allocation4], %s637_s18 }
 0x14d   : > { %p812_p3 = pnand %p815_p2, %p1050_p8 }
 0x14f   : > { %936 = dma.done.wait (!%p812_p3), %s638_s20, 128  }
 0x150   : > { %938 = vsyncadd (!%p812_p3), %s638_s20, 4294967168  ;;  %s19_s26 = sadd.s32 1, %s961_s26   ;;  %s1147_s21 = smov %s945_s22 }
 0x151   : > { %p16_p5 = scmp.ge.s32.totalorder %s19_s26, 4   ;;  %s1148_s22 = smov %s949_s23 }
 0x152   : > { %s1149_s23 = smov %s1056_s10  ;;  %s1150_s24 = smov %s957_s25 }
 0x153   : > { %s1151_s25 = smov %s1153_s29  ;;  %18 = sbr.rel (!%p16_p5) target bundleno = 6 (0x6), region = 91 }
 0x15a   :  { %643 = vsyncpa [#allocation4], 1 }
 0x15b   :  { %645 = vsyncpa [#allocation4 + $0x1], 1 }

</bundles_post_ra>
